<compile_context>
chip_gen: v7x
topology: tpu7x:2x2x1
jax: 0.10.0
libtpu: 0.0.40
codegen_flags: <defaults>
</compile_context>

<pallas_src>
import math
from functools import partial

import jax
import jax.numpy as jnp
from jax import lax
from jax.experimental import pallas as pl
from jax.experimental.pallas import tpu as pltpu

_LANE = 128          # lane width (last-dim alignment)
_SUBLANE = 8         # f32 sublane count
_MAX_TB = 256        # batch tile cap (matches 256-tall MXU on v6e/v7x)
_VMEM_BUDGET = 20 * 1024 * 1024        # conservative per-step working set
_EMBED_BLOCK_BUDGET = 8 * 1024 * 1024  # cap for the double-buffered embed tile

# Abramowitz & Stegun 4.4.46:
#   arcsin(z) = pi/2 - sqrt(1 - z) * (a0 + a1 z + ... + a7 z^7),  z in [0, 1]
# |error| <= 2e-8.  Keeps the inverse trig on VPU+EUP (no Mosaic arcsin needed).
_ASIN_COEFFS = (
    1.5707963050, -0.2145988016, 0.0889789874, -0.0501743046,
    0.0308918810, -0.0170881256, 0.0066700901, -0.0012624911,
)


def _arcsin01(z):
    """arcsin for z in [0, 1] via clamped minimax polynomial (f32)."""
    p = jnp.float32(_ASIN_COEFFS[-1])
    for c in _ASIN_COEFFS[-2::-1]:          # Horner: a7 -> a0
        p = p * z + jnp.float32(c)
    return jnp.float32(math.pi / 2) - jnp.sqrt(jnp.maximum(1.0 - z, 0.0)) * p


def _round_up(v, m):
    return (v + m - 1) // m * m


def _vmem_estimate(tb, tn, d_pad):
    # double-buffered x tile + embed tile + ev row + output block, plus ~4
    # (tb, tn) f32 temporaries for the dot/tail.
    return 4 * (2 * tb * d_pad + 2 * d_pad * tn + 2 * tn
                + 2 * _SUBLANE * tn + 4 * tb * tn)


def _pick_tb(b, d_pad, tn):
    tb = min(_MAX_TB, _round_up(b, _SUBLANE))
    while tb > _SUBLANE and _vmem_estimate(tb, tn, d_pad) > _VMEM_BUDGET:
        tb = max(_SUBLANE, _round_up(tb // 2, _SUBLANE))
    return tb


def _preprocess_embed(embed):
    """Done once in Prompt.__init__: pad, normalize, transpose, validity row."""
    embed = jnp.asarray(embed, jnp.float32)
    n, d = embed.shape
    d_pad = _round_up(d, _LANE)
    n_pad = _round_up(n, _LANE)
    # Largest lane-aligned N tile that divides n_pad and keeps the (d_pad, tn)
    # embed block comfortably double-bufferable.
    tn = _LANE
    for cand in (512, 384, 256, 128):
        if cand <= n_pad and n_pad % cand == 0 and \
                2 * 4 * d_pad * cand <= _EMBED_BLOCK_BUDGET:
            tn = cand
            break
    ep = jnp.zeros((n_pad, d_pad), jnp.float32).at[:n, :d].set(embed)
    sumsq = jnp.sum(ep * ep, axis=-1, keepdims=True)
    en = ep / jnp.maximum(jnp.sqrt(sumsq), 1e-12)      # F.normalize semantics
    en_t = jnp.asarray(en.T)                           # (d_pad, n_pad), K on sublane
    # ||normalize(e_n)||^2 indicator: 1 for non-zero rows, 0 for zero/padded rows.
    ev = (sumsq.T > 0).astype(jnp.float32)             # (1, n_pad)
    return en_t, ev, tn


def _make_prompt_kernel(tb, tn, *, b_real, n_real, mask_rows, mask_cols):
    """One (batch tile, embed tile) step: normalize x rows, pairwise chord
    distances on the MXU, fused arcsin^2 tail, masked column partial sums."""

    def kernel(x_ref, et_ref, ev_ref, o_ref):
        x = x_ref[...]                                   # (tb, d_pad) f32
        x_ss = jnp.sum(x * x, axis=-1, keepdims=True)    # (tb, 1) lane reduce
        # x / max(||x||, eps)  ==  x * rsqrt(max(||x||^2, eps^2))   (EUP rsqrt)
        xn = x * lax.rsqrt(jnp.maximum(x_ss, jnp.float32(1e-24)))
        xv = (x_ss > 0).astype(jnp.float32)              # ||xn||^2 in {0, 1}

        # (tb, d_pad) @ (d_pad, tn) — canonical MXU feed (K on RHS sublanes).
        dot = lax.dot_general(xn, et_ref[...], (((1,), (0,)), ((), ())),
                              preferred_element_type=jnp.float32)  # (tb, tn)

        d2 = jnp.maximum(xv + ev_ref[...] - 2.0 * dot, 0.0)   # chord^2 >= 0
        half = jnp.minimum(0.5 * jnp.sqrt(d2), 1.0)            # chord/2 in [0,1]
        a = _arcsin01(half)

        # Row mask folded into the "×2" factor (padded batch rows -> 0).
        if mask_rows:
            row = lax.broadcasted_iota(jnp.int32, (tb, 1), 0) + pl.program_id(0) * tb
            two_row = jnp.where(row < b_real, jnp.float32(2.0), jnp.float32(0.0))
        else:
            two_row = jnp.float32(2.0)
        dists = two_row * a * a                          # (tb, tn)

        colsum = jnp.sum(dists, axis=0, keepdims=True)   # (1, tn) partial sums
        if mask_cols:                                    # drop padded embed cols
            col = lax.broadcasted_iota(jnp.int32, (1, tn), 1) + pl.program_id(1) * tn
            colsum = jnp.where(col < n_real, colsum, 0.0)

        # Replicate across 8 sublanes -> (8, tn) lane-dense, unmasked store.
        o_ref[...] = jnp.broadcast_to(colsum, (_SUBLANE, tn))

    return kernel


@partial(jax.jit, static_argnames=("tb", "tn", "n_real"))
def _prompt_mean_dists(x, en_t, ev, *, tb, tn, n_real):
    """mean over (B, N) of 2*arcsin(||normalize(x_b) - en_n|| / 2)^2."""
    x = x.astype(jnp.float32)
    b, d = x.shape
    d_pad, n_pad = en_t.shape
    b_pad = _round_up(_round_up(b, _SUBLANE), tb)

    if b_pad != b or d_pad != d:
        xp = jnp.zeros((b_pad, d_pad), jnp.float32).at[:b, :d].set(x)
    else:
        xp = x                                   # aligned fast path: no extra copy

    nb, nj = b_pad // tb, n_pad // tn
    kernel = _make_prompt_kernel(tb, tn, b_real=b, n_real=n_real,
                                 mask_rows=(b_pad != b),
                                 mask_cols=(n_pad != n_real))

    est = _vmem_estimate(tb, tn, d_pad)
    vmem_limit = int(min(48 * 1024 * 1024, max(2 * est, 16 * 1024 * 1024)))

    out = pl.pallas_call(
        kernel,
        out_shape=jax.ShapeDtypeStruct((nb * _SUBLANE, n_pad), jnp.float32),
        grid=(nb, nj),
        in_specs=[
            pl.BlockSpec((tb, d_pad), lambda i, j: (i, 0)),   # x tile (j-invariant)
            pl.BlockSpec((d_pad, tn), lambda i, j: (0, j)),   # pre-normalized embed^T
            pl.BlockSpec((1, tn), lambda i, j: (0, j)),       # embed validity row
        ],
        out_specs=pl.BlockSpec((_SUBLANE, tn), lambda i, j: (i, j)),
        compiler_params=pltpu.CompilerParams(
            dimension_semantics=("parallel", "parallel"),     # v7x: both TCs busy
            vmem_limit_bytes=vmem_limit),
    )(xp, en_t, ev)

    # Each 8-row block replicates its tile's column partial sums 8x.
    return jnp.sum(out) / (float(_SUBLANE) * b * n_real)


def replace_grad(x_forward, x_backward):
    # ReplaceGrad.forward returns its first argument; the second only shapes the
    # backward pass, which this forward-only kernel does not implement.
    return x_forward


class Prompt:
    """JAX/Pallas equivalent of the PyTorch `Prompt` module (forward pass)."""

    def __init__(self, embed, replace_grad_fn, weight=1.0, stop=float('-inf')):
        embed = jnp.asarray(embed, jnp.float32)
        self.embed = embed                                  # (N, D) buffer
        self.weight = jnp.asarray(weight, jnp.float32)      # scalar buffer
        self.stop = jnp.asarray(stop, jnp.float32)          # scalar buffer
        self.replace_grad = replace_grad_fn
        self._n, self._d = embed.shape
        # Embed is a constant buffer: pad / normalize / transpose / validity
        # are computed once here, never per call, never per grid step.
        self._en_t, self._ev, self._tn = _preprocess_embed(embed)

    def __call__(self, x):
        x = jnp.asarray(x, jnp.float32)
        assert x.shape[-1] == self._d, "feature dims must match"
        tb = _pick_tb(x.shape[0], self._en_t.shape[0], self._tn)
        mean_raw = _prompt_mean_dists(x, self._en_t, self._ev,
                                      tb=tb, tn=self._tn, n_real=self._n)
        # mean(dists * sign(w)) == sign(w) * mean_raw (sign(w) is a scalar).
        dists_mean = jnp.sign(self.weight) * mean_raw
        # TODO(synk): replace_grad / stop only affect the backward pass; the
        # forward is the identity on its first argument.
        gated = self.replace_grad(dists_mean, jnp.maximum(dists_mean, self.stop))
        return jnp.abs(self.weight) * gated


def _reference_forward(x, embed, weight):
    """Pure-JAX reference mirroring the PyTorch module exactly."""
    xn = x / jnp.maximum(jnp.linalg.norm(x, axis=-1, keepdims=True), 1e-12)
    en = embed / jnp.maximum(jnp.linalg.norm(embed, axis=-1, keepdims=True), 1e-12)
    dmat = jnp.linalg.norm(xn[:, None, :] - en[None, :, :], axis=2)
    dists = jnp.arcsin(dmat / 2.0) ** 2 * 2.0 * jnp.sign(weight)
    return jnp.abs(weight) * jnp.mean(dists)


if __name__ == "__main__":
    key = jax.random.PRNGKey(0)
    kx, ke, kx2, ke2, kx3, ke3 = jax.random.split(key, 6)

    # Case 1/2: unaligned batch (row padding + masking), zero rows exercised.
    B, N, D = 6, 16, 128
    x = jax.random.normal(kx, (B, D), dtype=jnp.float32)
    embed = jax.random.normal(ke, (N, D), dtype=jnp.float32)
    x = x.at[2].set(0.0)          # all-zero input row (F.normalize -> 0 vector)
    embed = embed.at[3].set(0.0)  # all-zero embed row

    p1 = Prompt(embed, replace_grad, weight=1.0, stop=float('-inf'))
    out1 = jax.block_until_ready(p1(x))
    ref1 = jax.block_until_ready(_reference_forward(x, embed, p1.weight))
    assert jnp.allclose(out1, ref1, atol=1e-5, rtol=1e-5), (out1, ref1)

    p2 = Prompt(embed, replace_grad, weight=-0.5, stop=0.1)
    out2 = jax.block_until_ready(p2(x))
    ref2 = jax.block_until_ready(_reference_forward(x, embed, p2.weight))
    assert jnp.allclose(out2, ref2, atol=1e-5, rtol=1e-5), (out2, ref2)

    # Case 3: aligned batch, unaligned D and N (D padding + column masking).
    B3, N3, D3 = 8, 5, 72
    x3 = jax.random.normal(kx2, (B3, D3), dtype=jnp.float32)
    e3 = jax.random.normal(ke2, (N3, D3), dtype=jnp.float32)
    p3 = Prompt(e3, replace_grad, weight=2.0, stop=float('-inf'))
    out3 = jax.block_until_ready(p3(x3))
    ref3 = jax.block_until_ready(_reference_forward(x3, e3, p3.weight))
    assert jnp.allclose(out3, ref3, atol=1e-5, rtol=1e-5), (out3, ref3)

    # Case 4: fully (8,128)-aligned shapes — exercises the no-padding fast path.
    B4, N4, D4 = 16, 128, 128
    x4 = jax.random.normal(kx3, (B4, D4), dtype=jnp.float32)
    e4 = jax.random.normal(ke3, (N4, D4), dtype=jnp.float32)
    p4 = Prompt(e4, replace_grad, weight=1.0, stop=float('-inf'))
    out4 = jax.block_until_ready(p4(x4))
    ref4 = jax.block_until_ready(_reference_forward(x4, e4, p4.weight))
    assert jnp.allclose(out4, ref4, atol=1e-5, rtol=1e-5), (out4, ref4)

    print("KERNEL_OK")
</pallas_src>

<mosaic_0001>
module attributes {stable_mosaic.version = 11 : i64} {
  func.func @kernel(%arg0: i32, %arg1: i32, %arg2: memref<8x128xf32, #tpu.memory_space<vmem>>, %arg3: memref<128x128xf32, #tpu.memory_space<vmem>>, %arg4: memref<1x128xf32, #tpu.memory_space<vmem>>, %arg5: memref<8x128xf32, #tpu.memory_space<vmem>>) attributes {dimension_semantics = [#tpu.dimension_semantics<parallel>, #tpu.dimension_semantics<parallel>], iteration_bounds = array<i64: 1, 1>, scalar_prefetch = 0 : i64, scratch_operands = 0 : i64, tpu.core_type = #tpu.core_type<tc>, window_params = [{transform_indices = @transform_0, window_bounds = array<i64: 8, 128>}, {transform_indices = @transform_1, window_bounds = array<i64: 128, 128>}, {transform_indices = @transform_2, window_bounds = array<i64: 1, 128>}, {transform_indices = @transform_3, window_bounds = array<i64: 8, 128>}]} {
    %c0 = arith.constant 0 : index
    %c0_0 = arith.constant 0 : index
    %0 = vector.load %arg2[%c0, %c0_0] : memref<8x128xf32, #tpu.memory_space<vmem>>, vector<8x128xf32>
    %1 = arith.mulf %0, %0 : vector<8x128xf32>
    %cst = arith.constant dense<0.000000e+00> : vector<8xf32>
    %2 = vector.multi_reduction <add>, %1, %cst [1] : vector<8x128xf32> to vector<8xf32>
    %3 = vector.shape_cast %2 : vector<8xf32> to vector<8x1xf32>
    %cst_1 = arith.constant 1.000000e-24 : f32
    %4 = vector.broadcast %cst_1 : f32 to vector<8x1xf32>
    %5 = arith.maximumf %3, %4 : vector<8x1xf32>
    %6 = math.rsqrt %5 : vector<8x1xf32>
    %7 = vector.broadcast %6 : vector<8x1xf32> to vector<8x128xf32>
    %8 = arith.mulf %0, %7 : vector<8x128xf32>
    %cst_2 = arith.constant 0.000000e+00 : f32
    %9 = vector.broadcast %cst_2 : f32 to vector<8x1xf32>
    %10 = arith.cmpf ogt, %3, %9 : vector<8x1xf32>
    %11 = arith.extui %10 : vector<8x1xi1> to vector<8x1xi32>
    %12 = arith.sitofp %11 : vector<8x1xi32> to vector<8x1xf32>
    %c0_3 = arith.constant 0 : index
    %c0_4 = arith.constant 0 : index
    %13 = vector.load %arg3[%c0_3, %c0_4] : memref<128x128xf32, #tpu.memory_space<vmem>>, vector<128x128xf32>
    %cst_5 = arith.constant dense<0.000000e+00> : vector<8x128xf32>
    %14 = tpu.matmul %8, %13, %cst_5 {dimension_numbers = #tpu.dot_dimension_numbers<[1], [0], [0], [1], [0, 0, 1, 1], [], []>} : vector<8x128xf32>, vector<128x128xf32>, vector<8x128xf32> -> vector<8x128xf32>
    %c0_6 = arith.constant 0 : index
    %c0_7 = arith.constant 0 : index
    %15 = vector.load %arg4[%c0_6, %c0_7] : memref<1x128xf32, #tpu.memory_space<vmem>>, vector<1x128xf32>
    %16 = vector.broadcast %12 : vector<8x1xf32> to vector<8x128xf32>
    %17 = vector.broadcast %15 : vector<1x128xf32> to vector<8x128xf32>
    %18 = arith.addf %16, %17 : vector<8x128xf32>
    %cst_8 = arith.constant 2.000000e+00 : f32
    %19 = vector.broadcast %cst_8 : f32 to vector<8x128xf32>
    %20 = arith.mulf %19, %14 : vector<8x128xf32>
    %21 = arith.subf %18, %20 : vector<8x128xf32>
    %cst_9 = arith.constant 0.000000e+00 : f32
    %22 = vector.broadcast %cst_9 : f32 to vector<8x128xf32>
    %23 = arith.maximumf %21, %22 : vector<8x128xf32>
    %24 = math.sqrt %23 : vector<8x128xf32>
    %cst_10 = arith.constant 5.000000e-01 : f32
    %25 = vector.broadcast %cst_10 : f32 to vector<8x128xf32>
    %26 = arith.mulf %25, %24 : vector<8x128xf32>
    %cst_11 = arith.constant 1.000000e+00 : f32
    %27 = vector.broadcast %cst_11 : f32 to vector<8x128xf32>
    %28 = arith.minimumf %26, %27 : vector<8x128xf32>
    %cst_12 = arith.constant -0.0012624911 : f32
    %29 = vector.broadcast %cst_12 : f32 to vector<8x128xf32>
    %30 = arith.mulf %29, %28 : vector<8x128xf32>
    %cst_13 = arith.constant 6.670090e-03 : f32
    %31 = vector.broadcast %cst_13 : f32 to vector<8x128xf32>
    %32 = arith.addf %30, %31 : vector<8x128xf32>
    %33 = arith.mulf %32, %28 : vector<8x128xf32>
    %cst_14 = arith.constant -0.0170881264 : f32
    %34 = vector.broadcast %cst_14 : f32 to vector<8x128xf32>
    %35 = arith.addf %33, %34 : vector<8x128xf32>
    %36 = arith.mulf %35, %28 : vector<8x128xf32>
    %cst_15 = arith.constant 0.0308918804 : f32
    %37 = vector.broadcast %cst_15 : f32 to vector<8x128xf32>
    %38 = arith.addf %36, %37 : vector<8x128xf32>
    %39 = arith.mulf %38, %28 : vector<8x128xf32>
    %cst_16 = arith.constant -0.0501743034 : f32
    %40 = vector.broadcast %cst_16 : f32 to vector<8x128xf32>
    %41 = arith.addf %39, %40 : vector<8x128xf32>
    %42 = arith.mulf %41, %28 : vector<8x128xf32>
    %cst_17 = arith.constant 0.0889789909 : f32
    %43 = vector.broadcast %cst_17 : f32 to vector<8x128xf32>
    %44 = arith.addf %42, %43 : vector<8x128xf32>
    %45 = arith.mulf %44, %28 : vector<8x128xf32>
    %cst_18 = arith.constant -0.214598805 : f32
    %46 = vector.broadcast %cst_18 : f32 to vector<8x128xf32>
    %47 = arith.addf %45, %46 : vector<8x128xf32>
    %48 = arith.mulf %47, %28 : vector<8x128xf32>
    %cst_19 = arith.constant 1.57079625 : f32
    %49 = vector.broadcast %cst_19 : f32 to vector<8x128xf32>
    %50 = arith.addf %48, %49 : vector<8x128xf32>
    %cst_20 = arith.constant 1.000000e+00 : f32
    %51 = vector.broadcast %cst_20 : f32 to vector<8x128xf32>
    %52 = arith.subf %51, %28 : vector<8x128xf32>
    %cst_21 = arith.constant 0.000000e+00 : f32
    %53 = vector.broadcast %cst_21 : f32 to vector<8x128xf32>
    %54 = arith.maximumf %52, %53 : vector<8x128xf32>
    %55 = math.sqrt %54 : vector<8x128xf32>
    %56 = arith.mulf %55, %50 : vector<8x128xf32>
    %cst_22 = arith.constant 1.57079637 : f32
    %57 = vector.broadcast %cst_22 : f32 to vector<8x128xf32>
    %58 = arith.subf %57, %56 : vector<8x128xf32>
    %59 = tpu.iota {dimensions = array<i32: 0>} : vector<8x1xi32>
    %c8_i32 = arith.constant 8 : i32
    %60 = arith.muli %arg0, %c8_i32 : i32
    %61 = vector.broadcast %60 : i32 to vector<8x1xi32>
    %62 = arith.addi %59, %61 : vector<8x1xi32>
    %c6_i32 = arith.constant 6 : i32
    %63 = vector.broadcast %c6_i32 : i32 to vector<8x1xi32>
    %64 = arith.cmpi slt, %62, %63 : vector<8x1xi32>
    %cst_23 = arith.constant 2.000000e+00 : f32
    %cst_24 = arith.constant 0.000000e+00 : f32
    %65 = vector.broadcast %cst_23 : f32 to vector<8x1xf32>
    %66 = vector.broadcast %cst_24 : f32 to vector<8x1xf32>
    %67 = arith.select %64, %65, %66 : vector<8x1xi1>, vector<8x1xf32>
    %68 = vector.broadcast %67 : vector<8x1xf32> to vector<8x128xf32>
    %69 = arith.mulf %68, %58 : vector<8x128xf32>
    %70 = arith.mulf %69, %58 : vector<8x128xf32>
    %cst_25 = arith.constant dense<0.000000e+00> : vector<128xf32>
    %71 = vector.multi_reduction <add>, %70, %cst_25 [0] : vector<8x128xf32> to vector<128xf32>
    %72 = vector.shape_cast %71 : vector<128xf32> to vector<1x128xf32>
    %73 = tpu.iota {dimensions = array<i32: 1>} : vector<1x128xi32>
    %c128_i32 = arith.constant 128 : i32
    %74 = arith.muli %arg1, %c128_i32 : i32
    %75 = vector.broadcast %74 : i32 to vector<1x128xi32>
    %76 = arith.addi %73, %75 : vector<1x128xi32>
    %c16_i32 = arith.constant 16 : i32
    %77 = vector.broadcast %c16_i32 : i32 to vector<1x128xi32>
    %78 = arith.cmpi slt, %76, %77 : vector<1x128xi32>
    %cst_26 = arith.constant 0.000000e+00 : f32
    %79 = vector.broadcast %cst_26 : f32 to vector<1x128xf32>
    %80 = arith.select %78, %72, %79 : vector<1x128xi1>, vector<1x128xf32>
    %81 = vector.shape_cast %80 : vector<1x128xf32> to vector<1x128xf32>
    %82 = vector.broadcast %81 : vector<1x128xf32> to vector<8x128xf32>
    %c0_27 = arith.constant 0 : index
    %c0_28 = arith.constant 0 : index
    %83 = vector.load %arg5[%c0_27, %c0_28] : memref<8x128xf32, #tpu.memory_space<vmem>>, vector<8x128xf32>
    tpu.vector_store %arg5[%c0_27, %c0_28], %82 {strides = array<i32>} : memref<8x128xf32, #tpu.memory_space<vmem>>, vector<8x128xf32>,
    return
  }
  func.func @transform_0(%arg0: i32, %arg1: i32) -> (i32, i32) {
    %c0_i32 = arith.constant 0 : i32
    %c0_i32_0 = arith.constant 0 : i32
    return %arg0, %c0_i32 : i32, i32
  }
  func.func @transform_1(%arg0: i32, %arg1: i32) -> (i32, i32) {
    %c0_i32 = arith.constant 0 : i32
    %c0_i32_0 = arith.constant 0 : i32
    return %c0_i32, %arg1 : i32, i32
  }
  func.func @transform_2(%arg0: i32, %arg1: i32) -> (i32, i32) {
    %c0_i32 = arith.constant 0 : i32
    %c0_i32_0 = arith.constant 0 : i32
    return %c0_i32, %arg1 : i32, i32
  }
  func.func @transform_3(%arg0: i32, %arg1: i32) -> (i32, i32) {
    %c0_i32 = arith.constant 0 : i32
    return %arg0, %arg1 : i32, i32
  }
}

</mosaic_0001>

<bundles_post_ra>
// kernel: _prompt_mean_dists.1
= control target key start
LH: loop header
LB: loop body
LE: loop exit
PB: predicated region body
PF: predicated region fallthrough
CT: control target
= control target key end

     0   :  { %8 = vsyncpa [#allocation3], 0  ;;  %s311_s12 = smov [#allocation2]   ;;  %s361_s0 = inlined_call_operand.vmem [shape: f32[8,128], index: 0, kind: input, shape index: {}]   ;;  %s362_s1 = inlined_call_operand.hbm [shape: f32[128,128], index: 1, kind: input, shape index: {}]   ;;  %s363_s2 = inlined_call_operand.vmem [shape: f32[1,128], index: 2, kind: input, shape index: {}]   ;;  %s364_s3 = inlined_call_operand.vmem [shape: f32[8,128], index: 3, kind: output, shape index: {}]  }
   0x1   :  { %s16_s13 = sshll.u32 %s311_s12, 4  ;;  %s287_s16 = scalar_lea.hbm %s362_s1, 2048  ;;  %s17_s13 = int_to_ptr.vmem [resolvable:$true] %s16_s13 }
   0x2   :  { %p288_p0 = scmp.ne.s32.totalorder %s362_s1, %s287_s16  ;;  %p291_p1 = scmp.lt.u32.totalorder %s287_s16, %s362_s1 }
   0x4   :  { %p293_p2 = pnand %p291_p1, %p288_p0 }
   0x6   :  { %296 = shalt.err (!%p293_p2)
}
   0x7   :  { %s297_s21 = scalar_lea.vmem %s17_s13, 2048  ;;  %p302_p4 = scmp.lt.s32.totalorder %s17_s13, %s17_s13 }
   0x8   :  { %p298_p3 = scmp.ne.s32.totalorder %s17_s13, %s297_s21  ;;  %p303_p5 = scmp.lt.s32.totalorder %s297_s21, %s297_s21 }
   0xa   :  { %p304_p6 = por %p303_p5, %p302_p4 }
   0xc   :  { %p305_p7 = pnand %p304_p6, %p298_p3 }
   0xe   :  { %308 = shalt.err (!%p305_p7)
}
   0xf   :  { %s312_s22 = smov 128   ;;  %s313_s23 = smov 8  }
  0x10   :  { %22 = dma.hbm_to_vmem [thread:$0]  %s362_s1, 2048, %s17_s13, [#allocation3], %s312_s22, %s312_s22, %s313_s23  }
  0x11   :  { %309 = dma.done.wait [#allocation3], 2048  }
  0x12   :  { %310 = vsyncadd [#allocation3], 4294965248  ;;  %v314_v0 = vmov 0.0|0.0   ;;  %v28_v1 = vld [vmem:[%s361_s0] sm:$0xff]  ;;  %v39_v3 = vld [vmem:[#allocation2 + $0x8] sm:$0xff]  ;;  %vm315_vm0 = vmmov 0   ;;  %v169_v59 = vlaneseq }
  0x13   :  { %251 = vmatprep.subr.bf16.mxu0 %v314_v0  ;;  %v38_v2 = vld [vmem:[#allocation2] sm:$0xff]  ;;  %v29_v4 = vmul.f32 %v28_v1, %v28_v1  ;;  %v40_v6 = vld [vmem:[#allocation2 + $0x10] sm:$0xff]  ;;  %v41_v7 = vld [vmem:[#allocation2 + $0x18] sm:$0xff]  ;;  %v316_v23 = vmov 0.0  }
  0x14   :  { %v252_v5 = vpack.c.bf16 %v39_v3, %v38_v2  ;;  %v255_v8 = vpack.c.bf16 %v41_v7, %v40_v6  ;;  %v42_v9 = vld [vmem:[#allocation2 + $0x20] sm:$0xff]  ;;  %v43_v10 = vld [vmem:[#allocation2 + $0x28] sm:$0xff]  ;;  %v44_v12 = vld [vmem:[#allocation2 + $0x30] sm:$0xff]  ;;  %248 = vmatprep.mubr.msk.f32.mxu0 %vm315_vm0, %v316_v23  ;;  %v170_v63 = vshrl.u32 %v169_v59, 7 }
  0x15   :  { %30 = vadd.xlane.f32.xlu0 %v29_v4  ;;  %v258_v11 = vpack.c.bf16 %v43_v10, %v42_v9  ;;  %v45_v13 = vld [vmem:[#allocation2 + $0x38] sm:$0xff]  ;;  %v46_v15 = vld [vmem:[#allocation2 + $0x40] sm:$0xff]  ;;  %v47_v16 = vld [vmem:[#allocation2 + $0x48] sm:$0xff] }
  0x16   :  { %253 = vmatpush3.bf16.msra.mxu0 %v252_v5  ;;  %v261_v14 = vpack.c.bf16 %v45_v13, %v44_v12  ;;  %v264_v17 = vpack.c.bf16 %v47_v16, %v46_v15  ;;  %v48_v18 = vld [vmem:[#allocation2 + $0x50] sm:$0xff]  ;;  %v49_v19 = vld [vmem:[#allocation2 + $0x58] sm:$0xff]  ;;  %v50_v21 = vld [vmem:[#allocation2 + $0x60] sm:$0xff]  ;;  %vm174_vm5 = vcmp.lt.s32.totalorder %v170_v63, 6 }
  0x17   :  { %254 = vmatprep.subr.bf16.mxu0 %v314_v0  ;;  %v267_v20 = vpack.c.bf16 %v49_v19, %v48_v18  ;;  %v51_v22 = vld [vmem:[#allocation2 + $0x68] sm:$0xff]  ;;  %v52_v25 = vld [vmem:[#allocation2 + $0x70] sm:$0xff]  ;;  %v53_v26 = vld [vmem:[#allocation2 + $0x78] sm:$0xff]  ;;  %v175_v7 = vsel %vm174_vm5, 2.0, %v316_v23 }
  0x18   :  { %v270_v24 = vpack.c.bf16 %v51_v22, %v50_v21  ;;  %v273_v27 = vpack.c.bf16 %v53_v26, %v52_v25  ;;  %v198_v33 = vld [vmem:[%s363_s2] ss:$0 sm:$0xff] }
  0x1a   :  { %256 = vmatpush3.bf16.msra.mxu0 %v255_v8 }
  0x1b   :  { %257 = vmatprep.subr.bf16.mxu0 %v314_v0 }
  0x1e   :  { %259 = vmatpush3.bf16.msra.mxu0 %v258_v11 }
  0x1f   :  { %260 = vmatprep.subr.bf16.mxu0 %v314_v0 }
  0x22   :  { %262 = vmatpush3.bf16.msra.mxu0 %v261_v14  ;;  %v185_v14 = vand.u32 127, %v169_v59 }
  0x23   :  { %263 = vmatprep.subr.bf16.mxu0 %v314_v0 }
  0x24   :  { %vm189_vm7 = vcmp.lt.s32.totalorder %v185_v14, 16 }
  0x26   :  { %265 = vmatpush3.bf16.msra.mxu0 %v264_v17 }
  0x27   :  { %266 = vmatprep.subr.bf16.mxu0 %v314_v0 }
  0x2a   :  { %268 = vmatpush3.bf16.msra.mxu0 %v267_v20 }
  0x2b   :  { %269 = vmatprep.subr.bf16.mxu0 %v314_v0 }
  0x2e   :  { %271 = vmatpush3.bf16.msra.mxu0 %v270_v24 }
  0x2f   :  { %272 = vmatprep.subr.bf16.mxu0 %v314_v0 }
  0x32   :  { %274 = vmatpush3.bf16.msra.mxu0 %v273_v27 }
  0xa2   :  { %v31_v28 = vpop.xlane.xlu0 %30 }
  0xa3   :  { %v32_v29 = vmax.f32 %v31_v28, 1e-24  ;;  %vm35_vm1 = vcmp.gt.f32.partialorder %v31_v28, 0.0 }
  0xa4   :  { %v197_v32 = vsel %vm35_vm1, 1.0, %v316_v23 }
  0xa5   :  { %281 = vrsqrt.f32 %v32_v29  ;;  %v131_v35 = vadd.f32 %v198_v33, %v197_v32 }
  0xaf   :  { %v282_v30 = vpop.eup %281 }
  0xb0   :  { %v34_v31 = vmul.f32 %v282_v30, %v28_v1 }
  0xb2   :  { %249 = vmatmul.mubr.f32.vlgmr.msra.gmra.mrb[0].mxu0 %v34_v31 }
 0x185   :  { %v120_v34 = vpop.f32.mrb[0].mxu0 }
 0x186   :  { %v132_v36 = vmul.f32 2.0, %v120_v34  ;;  %v250_v37 = vpop.f32.mrb[1].mxu0 }
 0x188   :  { %v133_v38 = vsub.f32 %v131_v35, %v132_v36 }
 0x18a   :  { %v134_v39 = vmax.f32 %v133_v38, 0.0 }
 0x18c   :  { %283 = vrsqrt.f32 %v134_v39  ;;  %vm137_vm2 = vcmp.eq.f32.partialorder %v134_v39, inf  ;;  %v140_v42 = vand.u32 2147483648, %v134_v39  ;;  %vm139_vm3 = vcmp.eq.f32.partialorder %v134_v39, 0.0 }
 0x196   :  { %v284_v40 = vpop.eup %283 }
 0x197   :  { %v136_v41 = vmul.f32 %v284_v40, %v134_v39 }
 0x199   :  { %v138_v43 = vsel %vm137_vm2, %v134_v39, %v136_v41 }
 0x19a   :  { %v141_v44 = vsel %vm139_vm3, %v140_v42, %v138_v43 }
 0x19b   :  { %v142_v45 = vmul.f32 0.5, %v141_v44 }
 0x19d   :  { %v143_v46 = vmin.f32 %v142_v45, 1.0 }
 0x19f   :  { %v144_v47 = vmul.f32 -0.0012624911, %v143_v46  ;;  %v158_v48 = vsub.f32 1.0, %v143_v46 }
 0x1a1   :  { %v145_v49 = vadd.f32 0.00667009, %v144_v47  ;;  %v159_v50 = vmax.f32 %v158_v48, 0.0 }
 0x1a3   :  { %v146_v51 = vmul.f32 %v145_v49, %v143_v46  ;;  %285 = vrsqrt.f32 %v159_v50  ;;  %vm162_vm4 = vcmp.eq.f32.partialorder %v159_v50, inf  ;;  %v165_v3 = vand.u32 2147483648, %v159_v50 }
 0x1a4   :  { %vm164_vm6 = vcmp.eq.f32.partialorder %v159_v50, 0.0 }
 0x1a5   :  { %v147_v52 = vadd.f32 -0.017088126, %v146_v51 }
 0x1a7   :  { %v148_v53 = vmul.f32 %v147_v52, %v143_v46 }
 0x1a9   :  { %v149_v54 = vadd.f32 0.03089188, %v148_v53 }
 0x1ab   :  { %v150_v55 = vmul.f32 %v149_v54, %v143_v46 }
 0x1ad   :  { %v151_v56 = vadd.f32 -0.050174303, %v150_v55  ;;  %v286_v58 = vpop.eup %285 }
 0x1ae   :  { %v161_v62 = vmul.f32 %v286_v58, %v159_v50 }
 0x1af   :  { %v152_v57 = vmul.f32 %v151_v56, %v143_v46 }
 0x1b0   :  { %v163_v2 = vsel %vm162_vm4, %v159_v50, %v161_v62 }
 0x1b1   :  { %v153_v60 = vadd.f32 0.08897899, %v152_v57  ;;  %v166_v5 = vsel %vm164_vm6, %v165_v3, %v163_v2 }
 0x1b3   :  { %v154_v61 = vmul.f32 %v153_v60, %v143_v46 }
 0x1b5   :  { %v155_v0 = vadd.f32 -0.2145988, %v154_v61 }
 0x1b7   :  { %v156_v1 = vmul.f32 %v155_v0, %v143_v46 }
 0x1b9   :  { %v157_v4 = vadd.f32 1.5707963, %v156_v1 }
 0x1bb   :  { %v167_v6 = vmul.f32 %v166_v5, %v157_v4 }
 0x1bd   :  { %v168_v8 = vsub.f32 1.5707964, %v167_v6 }
 0x1bf   :  { %v176_v9 = vmul.f32 %v175_v7, %v168_v8 }
 0x1c1   :  { %v177_v10 = vmul.f32 %v176_v9, %v168_v8 }
 0x1c3   :  { %v178_v11 = vrot.slane %v177_v10, 4 }
 0x1c5   :  { %v179_v12 = vadd.f32 %v178_v11, %v177_v10 }
 0x1c7   :  { %v180_v13 = vrot.slane %v179_v12, 2 }
 0x1c9   :  { %v181_v15 = vadd.f32 %v180_v13, %v179_v12 }
 0x1cb   :  { %v182_v16 = vrot.slane %v181_v15, 1 }
 0x1cd   :  { %v183_v17 = vadd.f32 %v182_v16, %v181_v15 }
 0x1cf   :  { %v190_v18 = vsel %vm189_vm7, %v183_v17, 0.0 }
 0x1d0   :  { %191 = vst [vmem:[%s364_s3] sm:$0xff] %v190_v18 }
 0x1d1   :  { %196 = vsyncpa [#allocation3], 1 }

</bundles_post_ra>
